<compile_context>
chip_gen: v7x
topology: tpu7x:2x2x1
jax: 0.10.0
libtpu: 0.0.40
codegen_flags: <defaults>
</compile_context>

<pallas_src>
import functools

import jax
import jax.numpy as jnp
from jax.experimental import pallas as pl
from jax.experimental.pallas import tpu as pltpu


_MIB = 1024 * 1024
_TILE_VMEM_BUDGET = 42 * _MIB       # conservative: headroom under v7x's 64 MiB physical
_SINGLE_BUFFER_W_BYTES = 1 * _MIB   # single-buffer the invariant weight once it matters
_MAX_BLOCK_B = 1024                 # v6e sweet spot once the VMEM limit is raised


def _round_up(x, m):
    return (x + m - 1) // m * m


# ---------------------------------------------------------------------------
# Fused kernel body: logits = x @ W_t + b ; per-tile sum of smoothed CE
# ---------------------------------------------------------------------------
def _head_body(x_ref, wt_ref, b_ref, y_ref, logits_ref, loss_ref, *,
               batch_size, block_b, label_smoothing):
    # x_ref:      [TB, H]        (f32 or bf16)
    # wt_ref:     [H,  C]        (weight pre-transposed once in the wrapper)
    # b_ref:      [1,  C]
    # y_ref:      [TB, 1] int32
    # logits_ref: [TB, C]        (None in loss-only mode)
    # loss_ref:   [1, 1, 1]      per-tile partial CE sum (f32)
    i = pl.program_id(0)

    # ---- linear head (MXU, f32 accumulation) ----
    logits = jnp.dot(x_ref[...], wt_ref[...],
                     preferred_element_type=jnp.float32)
    logits = logits + b_ref[...].astype(jnp.float32)            # [TB, C] f32
    if logits_ref is not None:
        logits_ref[...] = logits.astype(logits_ref.dtype)

    # ---- label-smoothed cross entropy (f32, stable logsumexp) ----
    tb, num_labels = logits.shape
    m = jnp.max(logits, axis=-1, keepdims=True)                              # [TB,1]
    lse = m + jnp.log(jnp.sum(jnp.exp(logits - m), axis=-1, keepdims=True))  # [TB,1]

    # fused smoothed-target reduction: one cross-lane reduce, one [TB,C] temp
    eps = label_smoothing
    on_val = (1.0 - eps) + eps / num_labels
    off_val = eps / num_labels
    col = jax.lax.broadcasted_iota(jnp.int32, (tb, num_labels), 1)
    tgt = jnp.where(col == y_ref[...], on_val, off_val)                      # [TB,C]
    contrib = jnp.sum(tgt * logits, axis=-1, keepdims=True)                  # [TB,1]
    nll = lse - contrib

    # mask rows past the true batch size (partial last tile; the select also
    # discards any NaN/Inf coming from stale padded-row data)
    row = jax.lax.broadcasted_iota(jnp.int32, (tb, 1), 0) + i * block_b
    nll = jnp.where(row < batch_size, nll, 0.0)

    loss_ref[...] = jnp.sum(nll, axis=0, keepdims=True).reshape(1, 1, 1)


# ---------------------------------------------------------------------------
# VMEM-budgeted batch tile + explicit vmem_limit_bytes
# ---------------------------------------------------------------------------
def _tile_budget(H, C, x_itemsize, logits_itemsize, return_logits, w_itemsize,
                 w_buffers):
    """(per-batch-row bytes, fixed bytes) of VMEM, lane/sublane padded."""
    c_lanes = max(_round_up(C, 128), 128)
    h_lanes = max(_round_up(H, 128), 128)
    per_row = 2 * h_lanes * x_itemsize          # x, double-buffered
    per_row += 2 * 128 * 4                      # labels [TB,1] int32 (lane-padded)
    per_row += 2 * c_lanes * 4                  # f32 logits / exp compute temps
    if return_logits:
        per_row += 2 * c_lanes * logits_itemsize  # logits output, double-buffered
    fixed = w_buffers * _round_up(H, 8) * c_lanes * w_itemsize   # W_t (resident)
    fixed += 2 * 8 * c_lanes * 4                                 # bias
    fixed += 2 * 8 * 128 * 4                                     # loss partials
    return per_row, fixed


def _choose_block_b(B, per_row, fixed):
    cap = max((_TILE_VMEM_BUDGET - fixed) // max(per_row, 1), 8)
    cap = max(cap // 8 * 8, 8)                  # multiple of 8 sublanes
    return min(B, _MAX_BLOCK_B, cap)


# ---------------------------------------------------------------------------
# Module-equivalent forward
# ---------------------------------------------------------------------------
@functools.partial(jax.jit,
                   static_argnames=("label_smoothing", "block_b", "return_logits"))
def _fused_forward(pooled_output, weight, bias, labels,
                   label_smoothing, block_b, return_logits):
    B, H = pooled_output.shape
    C = weight.shape[0]
    x_itemsize = jnp.dtype(pooled_output.dtype).itemsize
    w_itemsize = jnp.dtype(weight.dtype).itemsize
    logits_dtype = pooled_output.dtype
    logits_itemsize = jnp.dtype(logits_dtype).itemsize

    # Single-buffer the grid-invariant weight once its footprint is big enough
    # to matter for the VMEM budget (frees ~C*H*itemsize, esp. useful on v7x).
    w_single_buffer = (C * H * w_itemsize) >= _SINGLE_BUFFER_W_BYTES
    w_buffers = 1 if w_single_buffer else 2

    per_row, fixed = _tile_budget(H, C, x_itemsize, logits_itemsize,
                                  return_logits, w_itemsize, w_buffers)
    if block_b is None:
        block_b = _choose_block_b(B, per_row, fixed)
    if block_b != B:
        assert block_b % 8 == 0, "batch tile must be a multiple of 8 sublanes"
    grid_b = pl.cdiv(B, block_b)

    # Explicit scoped-VMEM budget (v5e default is only 16 MiB; v6e/v7x 32 MiB).
    vmem_limit = max(32 * _MIB,
                     int(1.25 * (fixed + block_b * per_row)) + 2 * _MIB)

    # tiny glue: transpose PyTorch-layout weight ONCE (no per-tile transpose),
    # make bias/labels 2-D for VMEM blocks.
    wt = jnp.transpose(weight)                       # [H, C]
    bias2 = bias.reshape(1, C)
    labels2 = labels.astype(jnp.int32).reshape(B, 1)

    cost = pl.CostEstimate(
        flops=2 * B * H * C + 8 * B * C,
        transcendentals=B * C + B,                   # exp per logit + log per row
        bytes_accessed=(B * H * x_itemsize + C * H * w_itemsize
                        + C * 4 + B * 4 + grid_b * 4
                        + (B * C * logits_itemsize if return_logits else 0)),
    )

    body = functools.partial(_head_body, batch_size=B, block_b=block_b,
                             label_smoothing=float(label_smoothing))
    if return_logits:
        kernel = body
        out_shape = (jax.ShapeDtypeStruct((B, C), logits_dtype),
                     jax.ShapeDtypeStruct((grid_b, 1, 1), jnp.float32))
        out_specs = [pl.BlockSpec((block_b, C), lambda i: (i, 0)),
                     pl.BlockSpec((1, 1, 1), lambda i: (i, 0, 0))]
    else:
        kernel = lambda x, w, b, y, ls: body(x, w, b, y, None, ls)
        out_shape = jax.ShapeDtypeStruct((grid_b, 1, 1), jnp.float32)
        out_specs = pl.BlockSpec((1, 1, 1), lambda i: (i, 0, 0))

    if w_single_buffer:
        w_spec = pl.BlockSpec((H, C), lambda i: (0, 0),
                              pipeline_mode=pl.Buffered(1))
    else:
        w_spec = pl.BlockSpec((H, C), lambda i: (0, 0))

    outs = pl.pallas_call(
        kernel,
        out_shape=out_shape,
        grid_spec=pltpu.PrefetchScalarGridSpec(
            num_scalar_prefetch=0,
            grid=(grid_b,),
            in_specs=[
                pl.BlockSpec((block_b, H), lambda i: (i, 0)),   # x       (tiled)
                w_spec,                                         # W^T     (resident)
                pl.BlockSpec((1, C), lambda i: (0, 0)),         # bias    (resident)
                pl.BlockSpec((block_b, 1), lambda i: (i, 0)),   # labels  (tiled)
            ],
            out_specs=out_specs,
        ),
        compiler_params=pltpu.CompilerParams(
            # Per-tile partial sums are independent -> "parallel" lets v7x's
            # two TensorCores split the batch tiles (neutral on v5e/v6e).
            dimension_semantics=("parallel",),
            vmem_limit_bytes=vmem_limit,
        ),
        cost_estimate=cost,
    )(pooled_output, wt, bias2, labels2)

    if return_logits:
        logits, partials = outs
    else:
        logits, partials = None, outs
    loss = jnp.sum(partials) * (1.0 / B)             # pairwise-ish reduce in XLA
    return logits, loss


def classification_head_forward(pooled_output, weight, bias, labels=None, *,
                                label_smoothing=0.05, block_b=None,
                                return_logits=True):
    """Pallas equivalent of ClassificationHead.forward (dropout = identity, eval).

    pooled_output: [B, H] (f32 or bf16); weight: [C, H] (PyTorch layout);
    bias: [C]; labels: [B] int (or None). Returns (logits | None, loss | None).
    """
    if labels is None:
        B = pooled_output.shape[0]
        dummy = jnp.zeros((B,), jnp.int32)
        logits, _ = _fused_forward(pooled_output, weight, bias, dummy,
                                   label_smoothing=label_smoothing,
                                   block_b=block_b, return_logits=True)
        return logits, None
    if labels.ndim != 1:
        labels = labels[:, 0]
    return _fused_forward(pooled_output, weight, bias, labels,
                          label_smoothing=label_smoothing,
                          block_b=block_b, return_logits=return_logits)


if __name__ == "__main__":
    B, H, C = 16, 32, 8   # batch, hidden_size, num_labels
    TB = 8                # batch tile -> grid of 2, exercises per-tile partial sums

    key = jax.random.PRNGKey(0)
    kx, kw, kl = jax.random.split(key, 3)

    pooled_output = jax.random.normal(kx, (B, H), dtype=jnp.float32)
    # _init_weights(): weight ~ N(0, 0.02), bias = 0
    weight = 0.02 * jax.random.normal(kw, (C, H), dtype=jnp.float32)
    bias = jnp.zeros((C,), dtype=jnp.float32)
    labels = jax.random.randint(kl, (B,), 0, C, dtype=jnp.int32)

    logits, loss = classification_head_forward(pooled_output, weight, bias,
                                               labels, block_b=TB)
    jax.block_until_ready((logits, loss))

    # pure-JAX reference (same math as torch CrossEntropyLoss(label_smoothing=0.05))
    eps = 0.05
    ref_logits = pooled_output @ weight.T + bias
    lse = jax.nn.logsumexp(ref_logits, axis=-1)
    onehot = jax.nn.one_hot(labels, C, dtype=jnp.float32)
    tgt = (1.0 - eps) * onehot + eps / C
    ref_loss = jnp.mean(lse - jnp.sum(tgt * ref_logits, axis=-1))

    assert logits.shape == (B, C)
    assert loss.shape == ()
    assert jnp.allclose(logits, ref_logits, atol=2e-3, rtol=2e-3)
    assert jnp.allclose(loss, ref_loss, atol=2e-3, rtol=2e-3)

    # loss-only mode + bf16 inputs (the mem-bound levers from the perf review)
    _, loss_bf16 = classification_head_forward(
        pooled_output.astype(jnp.bfloat16), weight.astype(jnp.bfloat16), bias,
        labels, block_b=TB, return_logits=False)
    jax.block_until_ready(loss_bf16)
    assert jnp.allclose(loss_bf16, ref_loss, atol=3e-2, rtol=3e-2)

    # labels=None path (module returns loss=None) and auto block_b
    logits_only, none_loss = classification_head_forward(pooled_output, weight,
                                                         bias, None)
    jax.block_until_ready(logits_only)
    assert none_loss is None
    assert jnp.allclose(logits_only, ref_logits, atol=2e-3, rtol=2e-3)

    print("KERNEL_OK")
</pallas_src>

<mosaic_0001>
module attributes {stable_mosaic.version = 11 : i64} {
  func.func @_head_body(%arg0: i32, %arg1: memref<8x32xf32, #tpu.memory_space<vmem>>, %arg2: memref<32x8xf32, #tpu.memory_space<vmem>>, %arg3: memref<1x8xf32, #tpu.memory_space<vmem>>, %arg4: memref<8x1xi32, #tpu.memory_space<vmem>>, %arg5: memref<8x8xf32, #tpu.memory_space<vmem>>, %arg6: memref<1x1x1xf32, #tpu.memory_space<vmem>>) attributes {dimension_semantics = [#tpu.dimension_semantics<parallel>], iteration_bounds = array<i64: 2>, scalar_prefetch = 0 : i64, scratch_operands = 0 : i64, tpu.core_type = #tpu.core_type<tc>, window_params = [{transform_indices = @transform_0, window_bounds = array<i64: 8, 32>}, {pipeline_mode = #tpu.pipeline_mode<synchronous>, transform_indices = @transform_1, window_bounds = array<i64: 32, 8>}, {pipeline_mode = #tpu.pipeline_mode<synchronous>, transform_indices = @transform_2, window_bounds = array<i64: 1, 8>}, {transform_indices = @transform_3, window_bounds = array<i64: 8, 1>}, {transform_indices = @transform_4, window_bounds = array<i64: 8, 8>}, {transform_indices = @transform_5, window_bounds = array<i64: 1, 1, 1>}]} {
    %c0 = arith.constant 0 : index
    %c0_0 = arith.constant 0 : index
    %0 = vector.load %arg1[%c0, %c0_0] : memref<8x32xf32, #tpu.memory_space<vmem>>, vector<8x32xf32>
    %c0_1 = arith.constant 0 : index
    %c0_2 = arith.constant 0 : index
    %1 = vector.load %arg2[%c0_1, %c0_2] : memref<32x8xf32, #tpu.memory_space<vmem>>, vector<32x8xf32>
    %cst = arith.constant dense<0.000000e+00> : vector<8x8xf32>
    %2 = tpu.matmul %0, %1, %cst {dimension_numbers = #tpu.dot_dimension_numbers<[1], [0], [0], [1], [0, 0, 1, 1], [], []>} : vector<8x32xf32>, vector<32x8xf32>, vector<8x8xf32> -> vector<8x8xf32>
    %c0_3 = arith.constant 0 : index
    %c0_4 = arith.constant 0 : index
    %3 = vector.load %arg3[%c0_3, %c0_4] : memref<1x8xf32, #tpu.memory_space<vmem>>, vector<1x8xf32>
    %4 = vector.broadcast %3 : vector<1x8xf32> to vector<8x8xf32>
    %5 = arith.addf %2, %4 : vector<8x8xf32>
    %c0_5 = arith.constant 0 : index
    %c0_6 = arith.constant 0 : index
    %6 = vector.load %arg5[%c0_5, %c0_6] : memref<8x8xf32, #tpu.memory_space<vmem>>, vector<8x8xf32>
    tpu.vector_store %arg5[%c0_5, %c0_6], %5 {strides = array<i32>} : memref<8x8xf32, #tpu.memory_space<vmem>>, vector<8x8xf32>,
    %cst_7 = arith.constant dense<0xFF800000> : vector<8xf32>
    %7 = vector.multi_reduction <maximumf>, %5, %cst_7 [1] : vector<8x8xf32> to vector<8xf32>
    %8 = vector.shape_cast %7 : vector<8xf32> to vector<8x1xf32>
    %9 = vector.broadcast %8 : vector<8x1xf32> to vector<8x8xf32>
    %10 = arith.subf %5, %9 : vector<8x8xf32>
    %11 = math.exp %10 : vector<8x8xf32>
    %cst_8 = arith.constant dense<0.000000e+00> : vector<8xf32>
    %12 = vector.multi_reduction <add>, %11, %cst_8 [1] : vector<8x8xf32> to vector<8xf32>
    %13 = vector.shape_cast %12 : vector<8xf32> to vector<8x1xf32>
    %14 = math.log %13 : vector<8x1xf32>
    %15 = arith.addf %8, %14 : vector<8x1xf32>
    %16 = tpu.iota {dimensions = array<i32: 1>} : vector<8x8xi32>
    %c0_9 = arith.constant 0 : index
    %c0_10 = arith.constant 0 : index
    %17 = vector.load %arg4[%c0_9, %c0_10] : memref<8x1xi32, #tpu.memory_space<vmem>>, vector<8x1xi32>
    %18 = vector.broadcast %17 : vector<8x1xi32> to vector<8x8xi32>
    %19 = arith.cmpi eq, %16, %18 : vector<8x8xi32>
    %cst_11 = arith.constant 9.562500e-01 : f32
    %cst_12 = arith.constant 6.250000e-03 : f32
    %20 = vector.broadcast %cst_11 : f32 to vector<8x8xf32>
    %21 = vector.broadcast %cst_12 : f32 to vector<8x8xf32>
    %22 = arith.select %19, %20, %21 : vector<8x8xi1>, vector<8x8xf32>
    %23 = arith.mulf %22, %5 : vector<8x8xf32>
    %cst_13 = arith.constant dense<0.000000e+00> : vector<8xf32>
    %24 = vector.multi_reduction <add>, %23, %cst_13 [1] : vector<8x8xf32> to vector<8xf32>
    %25 = vector.shape_cast %24 : vector<8xf32> to vector<8x1xf32>
    %26 = arith.subf %15, %25 : vector<8x1xf32>
    %27 = tpu.iota {dimensions = array<i32: 0>} : vector<8x1xi32>
    %c8_i32 = arith.constant 8 : i32
    %28 = arith.muli %arg0, %c8_i32 : i32
    %29 = vector.broadcast %28 : i32 to vector<8x1xi32>
    %30 = arith.addi %27, %29 : vector<8x1xi32>
    %c16_i32 = arith.constant 16 : i32
    %31 = vector.broadcast %c16_i32 : i32 to vector<8x1xi32>
    %32 = arith.cmpi slt, %30, %31 : vector<8x1xi32>
    %cst_14 = arith.constant 0.000000e+00 : f32
    %33 = vector.broadcast %cst_14 : f32 to vector<8x1xf32>
    %34 = arith.select %32, %26, %33 : vector<8x1xi1>, vector<8x1xf32>
    %cst_15 = arith.constant dense<0.000000e+00> : vector<1xf32>
    %35 = vector.multi_reduction <add>, %34, %cst_15 [0] : vector<8x1xf32> to vector<1xf32>
    %36 = vector.shape_cast %35 : vector<1xf32> to vector<1x1xf32>
    %37 = vector.shape_cast %36 : vector<1x1xf32> to vector<1x1x1xf32>
    %c0_16 = arith.constant 0 : index
    %c0_17 = arith.constant 0 : index
    %c0_18 = arith.constant 0 : index
    %38 = vector.load %arg6[%c0_16, %c0_17, %c0_18] : memref<1x1x1xf32, #tpu.memory_space<vmem>>, vector<1x1x1xf32>
    tpu.vector_store %arg6[%c0_16, %c0_17, %c0_18], %37 {strides = array<i32>} : memref<1x1x1xf32, #tpu.memory_space<vmem>>, vector<1x1x1xf32>,
    return
  }
  func.func @transform_0(%arg0: i32) -> (i32, i32) {
    %c0_i32 = arith.constant 0 : i32
    %c0_i32_0 = arith.constant 0 : i32
    return %arg0, %c0_i32 : i32, i32
  }
  func.func @transform_1(%arg0: i32) -> (i32, i32) {
    %c0_i32 = arith.constant 0 : i32
    %c0_i32_0 = arith.constant 0 : i32
    %c0_i32_1 = arith.constant 0 : i32
    return %c0_i32, %c0_i32_0 : i32, i32
  }
  func.func @transform_2(%arg0: i32) -> (i32, i32) {
    %c0_i32 = arith.constant 0 : i32
    %c0_i32_0 = arith.constant 0 : i32
    %c0_i32_1 = arith.constant 0 : i32
    return %c0_i32, %c0_i32_0 : i32, i32
  }
  func.func @transform_3(%arg0: i32) -> (i32, i32) {
    %c0_i32 = arith.constant 0 : i32
    %c0_i32_0 = arith.constant 0 : i32
    return %arg0, %c0_i32 : i32, i32
  }
  func.func @transform_4(%arg0: i32) -> (i32, i32) {
    %c0_i32 = arith.constant 0 : i32
    %c0_i32_0 = arith.constant 0 : i32
    return %arg0, %c0_i32 : i32, i32
  }
  func.func @transform_5(%arg0: i32) -> (i32, i32, i32) {
    %c0_i32 = arith.constant 0 : i32
    %c0_i32_0 = arith.constant 0 : i32
    %c0_i32_1 = arith.constant 0 : i32
    return %arg0, %c0_i32, %c0_i32_0 : i32, i32, i32
  }
}

</mosaic_0001>

<bundles_post_ra>
// kernel: _fused_forward.1
= control target key start
LH: loop header
LB: loop body
LE: loop exit
PB: predicated region body
PF: predicated region fallthrough
CT: control target
= control target key end

     0   :  { %s560_s18 = smov 0   ;;  %s611_s0 = inlined_call_operand.vmem [shape: f32[16,32], index: 0, kind: input, shape index: {}]   ;;  %s612_s1 = inlined_call_operand.vmem [shape: f32[32,8], index: 1, kind: input, shape index: {}]   ;;  %s613_s2 = inlined_call_operand.vmem [shape: f32[1,8], index: 2, kind: input, shape index: {}]   ;;  %s614_s3 = inlined_call_operand.vmem [shape: s32[16,1], index: 3, kind: input, shape index: {}]   ;;  %s615_s4 = inlined_call_operand.vmem [shape: f32[16,8], index: 4, kind: output, shape index: {0}]   ;;  %s616_s5 = inlined_call_operand.vmem [shape: f32[2,1,1], index: 5, kind: output, shape index: {1}]  }
   0x1 LB: > { %s566_s19 = sadd.s32 4294967295, %s523_s18   ;;  %p468_p0 = scmp.ge.s32.totalorder %s523_s18, 1  ;;  %s523_s18 = sphi %s560_s18, %s16_s18  }
   0x2   : > { %p198_p1 = scmp.lt.s32.totalorder %s523_s18, 3 }
   0x4   : > { %p199_p2 = pnand %p468_p0, %p198_p1 }
   0x5   : > { %v247_v0 = vld [vmem:[%s612_s1] sm:$0xff] (!%p199_p2)  ;;  %v248_v1 = vld [vmem:[%s612_s1 + $0x8] sm:$0xff] (!%p199_p2)  ;;  %v249_v2 = vld [vmem:[%s612_s1 + $0x10] sm:$0xff] (!%p199_p2)  ;;  %v525_v3 = vmov (!%p199_p2), 0.0|0.0   ;;  %vm526_vm0 = vmmov (!%p199_p2), 0   ;;  %v527_v6 = vmov (!%p199_p2), 0.0   ;;  %v346_v18 = vlaneseq (!%p199_p2) }
   0x6   : > { %202 = sbr.rel (%p199_p2) target bundleno = 564 (0x234), region = 36  ;;  %493 = vmatprep.subr.bf16.mxu0 (!%p199_p2), %v525_v3  ;;  %v494_v4 = vpack.c.bf16 (!%p199_p2), %v248_v1, %v247_v0  ;;  %v250_v5 = vld [vmem:[%s612_s1 + $0x18] sm:$0xff] (!%p199_p2)  ;;  %490 = vmatprep.mubr.msk.f32.mxu0 (!%p199_p2), %vm526_vm0, %v527_v6  ;;  %p231_p3 = scmp.lt.s32.totalorder (!%p199_p2), %s566_s19, 1  ;;  %vm258_vm1 = vcmask (!%p199_p2), 261120   ;;  %v528_v9 = vmov (!%p199_p2), 0   ;;  %vm332_vm2 = vcmask (!%p199_p2), 64512  }
   0x7   : > { %v497_v7 = vpack.c.bf16 (!%p199_p2), %v250_v5, %v249_v2  ;;  %512 = vset.pattern.permute.xlu0 (!%p199_p2), %v528_v9  ;;  %v472_v10 = vld [vmem:[%s613_s2] ss:$0 sm:$0xff] (!%p199_p2)  ;;  %v347_v20 = vand.u32 (!%p199_p2), 127, %v346_v18  ;;  %v529_v22 = vmov (!%p199_p2), 0.00625   ;;  %s474_s16 = sshll.u32 (!%p199_p2), %s566_s19, 3 }
   0x8   : > { %495 = vmatpush3.bf16.msra.mxu0 (!%p199_p2), %v494_v4  ;;  %v360_v29 = vshrl.u32 (!%p199_p2), %v346_v18, 7  ;;  %v362_v30 = vstv (!%p199_p2), %s474_s16  ;;  %vm372_vm5 = vcmask (!%p199_p2), 0  }
   0x9   : > { %496 = vmatprep.subr.bf16.mxu0 (!%p199_p2), %v525_v3 }
   0xa   : > { %v363_v32 = vadd.s32 (!%p199_p2), %v362_v30, %v360_v29 }
   0xc   : > { %498 = vmatpush3.bf16.msra.mxu0 (!%p199_p2), %v497_v7  ;;  %vm364_vm4 = vcmp.lt.s32.totalorder (!%p199_p2), %v363_v32, 16 }
   0xd   : > { %s584_s28 = scalar_select %p231_p3, %s566_s19, 1 }
   0xf   : > { %s469_s29 = sshll.u32 %s584_s28, 3  ;;  %s245_s19 = scalar_lea.vmem %s616_s5, %s584_s28 }
  0x10   : > { %s234_s7 = scalar_lea.vmem %s611_s0, %s469_s29  ;;  %s242_s12 = scalar_lea.vmem %s615_s4, %s469_s29 }
  0x11   : > { %v246_v8 = vld [vmem:[%s234_s7] sm:$0xff]  ;;  %s238_s15 = scalar_lea.vmem %s614_s3, %s469_s29 }
  0x12   : > { %491 = vmatmul.mubr.msk.f32.vlgmr.msra.gmra.mrb[0].mxu0 %vm258_vm1, %v246_v8  ;;  %v348_v15 = vld [vmem:[%s238_s15] sm:$0xff] }
  0xe5   : > { %v328_v11 = vpop.f32.mrb[0].mxu0 }
  0xe6   : > { %v329_v12 = vadd.f32 %v472_v10, %v328_v11  ;;  %v492_v13 = vpop.f32.mrb[1].mxu0 }
  0xe8   : > { %v334_v14 = vsel %vm332_vm2, %v329_v12, -inf  ;;  %333 = vst.msk [vmem:[%s242_s12] sm:$0xff] %vm332_vm2, %v329_v12 }
  0xe9   : > { %335 = vmax.xlane.f32.xlu0 %v334_v14 }
  0xff   : > { %350 = vperm.xlu0 %512, %v348_v15  }
 0x176   : > { %v336_v16 = vpop.xlane.xlu0 %335 }
 0x177   : > { %v337_v17 = vsub.f32 %v329_v12, %v336_v16 }
 0x179   : > { %v338_v19 = vmul.f32 1.442695, %v337_v17 }
 0x17b   : > { %513 = vpow2.f32 %v338_v19 }
 0x17e   : > { %v351_v21 = vpop.permute.xlu0 %350 }
 0x17f   : > { %vm352_vm3 = vcmp.eq.s32.totalorder %v347_v20, %v351_v21 }
 0x180   : > { %v353_v23 = vsel %vm352_vm3, 0.95625, %v529_v22 }
 0x181   : > { %v354_v26 = vmul.f32 %v353_v23, %v329_v12 }
 0x183   : > { %v355_v27 = vsel %vm332_vm2, %v354_v26, 0.0 }
 0x185   : > { %v514_v24 = vpop.eup %513 }
 0x186   : > { %v340_v25 = vsel %vm332_vm2, %v514_v24, 0.0 }
 0x187   : > { %341 = vadd.xlane.f32.xlu1 %v340_v25 }
 0x18b   : > { %356 = vadd.xlane.f32.xlu1 %v355_v27 }
 0x214   : > { %v342_v28 = vpop.xlane.xlu1 %341 }
 0x215   : > { %515 = vlog2.f32 %v342_v28 }
 0x218   : > { %v357_v35 = vpop.xlane.xlu1 %356 }
 0x21f   : > { %v516_v31 = vpop.eup %515 }
 0x220   : > { %v344_v33 = vmul.f32 0.6931472, %v516_v31 }
 0x222   : > { %v345_v34 = vadd.f32 %v344_v33, %v336_v16 }
 0x224   : > { %v358_v36 = vsub.f32 %v345_v34, %v357_v35 }
 0x226   : > { %v365_v37 = vsel %vm364_vm4, %v358_v36, 0.0 }
 0x227   : > { %v366_v38 = vrot.slane %v365_v37, 4 }
 0x229   : > { %v367_v39 = vadd.f32 %v366_v38, %v365_v37 }
 0x22b   : > { %v368_v40 = vrot.slane %v367_v39, 2 }
 0x22d   : > { %v369_v41 = vadd.f32 %v368_v40, %v367_v39 }
 0x22f   : > { %v370_v42 = vrot.slane %v369_v41, 1 }
 0x231   : > { %v371_v43 = vadd.f32 %v370_v42, %v369_v41 }
 0x233   : > { %373 = vst.msk [vmem:[%s245_s19] sm:$0x1] %vm372_vm5, %v371_v43 }
 0x234 PF: > { %s16_s18 = sadd.s32 1, %s523_s18  }
 0x235   : > { %p13_p4 = scmp.ge.s32.totalorder %s16_s18, 4  }
 0x237   :  { %15 = sbr.rel (!%p13_p4) target bundleno = 1 (0x1), region = 81 }

</bundles_post_ra>
